<compile_context>
chip_gen: v5e
topology: v5e:2x2
jax: 0.10.0
libtpu: 0.0.40
codegen_flags: <defaults>
</compile_context>

<pallas_src>
import math
from functools import partial

import jax
import jax.numpy as jnp
import numpy as np
from jax.experimental import pallas as pl
from jax.experimental.pallas import tpu as pltpu

# ----- hyperparameters mirroring the PyTorch module -------------------------
INPUT_SIZE = 4                    # X_train.shape[2]
HIDDEN = 8                        # hidden_size
NUM_LAYERS = 4                    # num_layers
NUM_PRED = 12                     # num_predicted
OUT_DIM = INPUT_SIZE * NUM_PRED   # 48

D_IN = -(-INPUT_SIZE // 8) * 8    # input features padded to sublane multiple (8)
OUT_PAD = -(-OUT_DIM // 128) * 128  # fc output lane-padded (128)


# ----- Pallas kernel: wavefront over diagonals d = layer + t -----------------
def _lstm_wavefront_kernel(x_ref, wx_ref, wh_ref, b_ref, wfc_ref, bfc_ref,
                           out_ref, *, num_layers, hidden, seq_len, batch):
    """Stacked LSTM + final Linear, wavefront-parallel over layers.

    x_ref:   ((T+L-1)*B, D_IN)  time-major layer-0 input, zero rows for t >= T
    wx_ref:  (D_IN, 128)        x -> gates (layer-0 columns only), gate-major,
                                i/f/o columns pre-scaled by 0.5
    wh_ref:  (L*H, 128)         [h_0|h_1|h_2|h_3] -> gates; holds every layer's
                                W_hh block AND layer l's W_ih block routed from
                                the h_{l-1} rows (block-packed), gate-major,
                                i/f/o columns pre-scaled by 0.5
    b_ref:   (1, 128)           (b_ih + b_hh) per layer, gate-major, pre-scaled
    wfc_ref: (H, OUT_PAD)       fc weight, transposed, lane-padded
    bfc_ref: (1, OUT_PAD)
    out_ref: (B, OUT_PAD)
    """
    L, H, T, B = num_layers, hidden, seq_len, batch
    G = L * H                       # lanes per gate group across layers (32)
    n_diag = T + L - 1              # 11 serial wavefront steps

    # Hoisted off the serial chain: layer-0 input projection for every time
    # step plus the per-layer biases, in one MXU matmul + one broadcast add.
    gx_b = jnp.dot(x_ref[...], wx_ref[...],
                   preferred_element_type=jnp.float32) + b_ref[...]  # (n_diag*B, 4G)

    wh = wh_ref[...]                                                 # (L*H, 4G)

    # Lane index, hoisted; used for the per-diagonal active-layer select.
    lane = jax.lax.broadcasted_iota(jnp.int32, (B, G), 1)

    # Layer-concatenated recurrent state, resident in vregs the whole time.
    h_all = jnp.zeros((B, G), jnp.float32)    # [h_0 | h_1 | h_2 | h_3]
    c_all = jnp.zeros((B, G), jnp.float32)

    for d in range(n_diag):         # fully unrolled; everything below is static
        # One lane-dense recurrent matmul covers all 4 layers' gates: layer l's
        # "input" h_{l-1}(t) and its own h_l(t-1) both live in h_all after the
        # previous diagonal.
        gates = gx_b[d * B:(d + 1) * B] + jnp.dot(
            h_all, wh, preferred_element_type=jnp.float32)           # (B, 4G)

        # One EUP pass over the full 128-lane gate tile. sigmoid(x) =
        # 0.5*tanh(x/2)+0.5; the 0.5 pre-scale lives in the i/f/o weights/bias.
        act = jnp.tanh(gates)
        i_all = 0.5 * act[:, 0 * G:1 * G] + 0.5
        f_all = 0.5 * act[:, 1 * G:2 * G] + 0.5
        g_all = act[:, 2 * G:3 * G]
        o_all = 0.5 * act[:, 3 * G:4 * G] + 0.5

        c_new = f_all * c_all + i_all * g_all
        h_new = o_all * jnp.tanh(c_new)

        # Only layers lo..hi are live on this diagonal (0 <= t = d - l < T);
        # keep the rest of the state untouched (cheap VPU select, 6/11 diags).
        lo = max(0, d - T + 1)
        hi = min(L - 1, d)
        if lo == 0 and hi == L - 1:
            c_all, h_all = c_new, h_new
        else:
            mask = (lane >= lo * H) & (lane < (hi + 1) * H)
            c_all = jnp.where(mask, c_new, c_all)
            h_all = jnp.where(mask, h_new, h_all)

    # fc(out[:, -1, :]) on the top layer's final hidden state; unmasked
    # lane-dense store.
    h_top = h_all[:, (L - 1) * H:L * H]
    out_ref[...] = (jnp.dot(h_top, wfc_ref[...],
                            preferred_element_type=jnp.float32) + bfc_ref[...])


# ----- one-time parameter packing (host-side numpy; zero per-call XLA ops) ---
def pack_params(layer_params, fc_w, fc_b):
    """Pack PyTorch-layout LSTM/Linear params into the kernel's layout.

    Gate-major lane layout: column g*G + l*H + j for gate g in (i,f,g,o),
    layer l, unit j. i/f/o columns (and their biases) are pre-scaled by 0.5
    for the sigmoid-via-tanh identity.
    """
    L, H, I = NUM_LAYERS, HIDDEN, INPUT_SIZE
    G = L * H
    LANES = 4 * G
    gate_scale = (0.5, 0.5, 1.0, 0.5)   # i, f, g, o

    wx = np.zeros((D_IN, LANES), np.float32)
    wh = np.zeros((L * H, LANES), np.float32)
    b = np.zeros((1, LANES), np.float32)

    for l, (w_ih, w_hh, b_ih, b_hh) in enumerate(layer_params):
        w_ih = np.asarray(w_ih, np.float32)
        w_hh = np.asarray(w_hh, np.float32)
        bb = np.asarray(b_ih, np.float32) + np.asarray(b_hh, np.float32)
        for g in range(4):
            s = gate_scale[g]
            cols = slice(g * G + l * H, g * G + (l + 1) * H)
            rows = slice(g * H, (g + 1) * H)
            # recurrent block: h_l -> layer-l gates
            wh[l * H:(l + 1) * H, cols] = w_hh[rows, :].T * s
            # input block: x -> layer-0 gates, h_{l-1} -> layer-l gates (l>0)
            if l == 0:
                wx[:w_ih.shape[1], cols] = w_ih[rows, :].T * s
            else:
                wh[(l - 1) * H:l * H, cols] = w_ih[rows, :].T * s
            b[0, cols] = bb[rows] * s

    wfc = np.zeros((H, OUT_PAD), np.float32)
    wfc[:, :OUT_DIM] = np.asarray(fc_w, np.float32).T
    bfc = np.zeros((1, OUT_PAD), np.float32)
    bfc[0, :OUT_DIM] = np.asarray(fc_b, np.float32)

    return (jnp.asarray(wx), jnp.asarray(wh), jnp.asarray(b),
            jnp.asarray(wfc), jnp.asarray(bfc))


# ----- per-call wrapper (activation layout glue only) ------------------------
@jax.jit
def lstm_model_forward(x, packed):
    """x: (B, T, INPUT_SIZE) float32 -> (B, NUM_PRED, INPUT_SIZE)."""
    wx, wh, b, wfc, bfc = packed
    B, T, I = x.shape
    L, H = NUM_LAYERS, HIDDEN
    B_pad = -(-B // 8) * 8          # full 8-row sublane tile
    n_diag = T + L - 1

    # batch-pad, feature-pad, zero-pad time to T+L-1, time-major, flatten rows.
    x_p = jnp.zeros((B_pad, n_diag, D_IN), jnp.float32)
    x_p = x_p.at[:B, :T, :I].set(x)
    x_tb = jnp.transpose(x_p, (1, 0, 2)).reshape(n_diag * B_pad, D_IN)

    kernel = partial(_lstm_wavefront_kernel, num_layers=L, hidden=H,
                     seq_len=T, batch=B_pad)

    # Gridless single program: operands total ~20 KB, purely latency-bound on
    # every generation. For B_pad >= 16 on v7x, add a batch grid axis with
    # dimension_semantics=("parallel",) to split across the two TensorCores.
    out = pl.pallas_call(
        kernel,
        out_shape=jax.ShapeDtypeStruct((B_pad, OUT_PAD), jnp.float32),
        in_specs=[pl.BlockSpec(memory_space=pltpu.MemorySpace.VMEM)] * 6,
        out_specs=pl.BlockSpec(memory_space=pltpu.MemorySpace.VMEM),
    )(x_tb, wx, wh, b, wfc, bfc)

    return out[:B, :OUT_DIM].reshape(B, NUM_PRED, I)


# ----- deterministic parameter init (same shapes / U(-1/sqrt(H),1/sqrt(H)) as PyTorch) ---
def make_params(key):
    k = 1.0 / math.sqrt(HIDDEN)
    keys = jax.random.split(key, 4 * NUM_LAYERS + 2)
    layer_params, idx = [], 0
    for layer in range(NUM_LAYERS):
        in_dim = INPUT_SIZE if layer == 0 else HIDDEN
        w_ih = jax.random.uniform(keys[idx], (4 * HIDDEN, in_dim), jnp.float32, -k, k); idx += 1
        w_hh = jax.random.uniform(keys[idx], (4 * HIDDEN, HIDDEN), jnp.float32, -k, k); idx += 1
        b_ih = jax.random.uniform(keys[idx], (4 * HIDDEN,), jnp.float32, -k, k); idx += 1
        b_hh = jax.random.uniform(keys[idx], (4 * HIDDEN,), jnp.float32, -k, k); idx += 1
        layer_params.append((w_ih, w_hh, b_ih, b_hh))
    fc_w = jax.random.uniform(keys[idx], (OUT_DIM, HIDDEN), jnp.float32, -k, k); idx += 1
    fc_b = jax.random.uniform(keys[idx], (OUT_DIM,), jnp.float32, -k, k)
    return layer_params, fc_w, fc_b


# ----- pure-JAX reference (semantics of the PyTorch forward) -----------------
def ref_forward(x, layer_params, fc_w, fc_b):
    B, T, I = x.shape
    seq = x
    for (w_ih, w_hh, b_ih, b_hh) in layer_params:
        h = jnp.zeros((B, HIDDEN), jnp.float32)
        c = jnp.zeros((B, HIDDEN), jnp.float32)
        outs = []
        for t in range(T):
            g = seq[:, t] @ w_ih.T + b_ih + h @ w_hh.T + b_hh
            i = jax.nn.sigmoid(g[:, 0 * HIDDEN:1 * HIDDEN])
            f = jax.nn.sigmoid(g[:, 1 * HIDDEN:2 * HIDDEN])
            gg = jnp.tanh(g[:, 2 * HIDDEN:3 * HIDDEN])
            o = jax.nn.sigmoid(g[:, 3 * HIDDEN:4 * HIDDEN])
            c = f * c + i * gg
            h = o * jnp.tanh(c)
            outs.append(h)
        seq = jnp.stack(outs, axis=1)
    out = seq[:, -1] @ fc_w.T + fc_b
    return out.reshape(B, NUM_PRED, I)


if __name__ == "__main__":
    key = jax.random.PRNGKey(0)
    pkey, xkey = jax.random.split(key)
    layer_params, fc_w, fc_b = make_params(pkey)
    packed = pack_params(layer_params, fc_w, fc_b)   # once, at init time

    B, T = 2, 8
    x = jax.random.normal(xkey, (B, T, INPUT_SIZE), jnp.float32)

    out = lstm_model_forward(x, packed)
    out = jax.block_until_ready(out)

    ref = ref_forward(x, layer_params, fc_w, fc_b)
    assert out.shape == (B, NUM_PRED, INPUT_SIZE)
    np.testing.assert_allclose(np.asarray(out), np.asarray(ref),
                               rtol=2e-4, atol=2e-4)
    print("KERNEL_OK")
</pallas_src>

<mosaic_0001>
module attributes {stable_mosaic.version = 11 : i64} {
  func.func @_lstm_wavefront_kernel(%arg0: memref<88x8xf32, #tpu.memory_space<vmem>>, %arg1: memref<8x128xf32, #tpu.memory_space<vmem>>, %arg2: memref<32x128xf32, #tpu.memory_space<vmem>>, %arg3: memref<1x128xf32, #tpu.memory_space<vmem>>, %arg4: memref<8x128xf32, #tpu.memory_space<vmem>>, %arg5: memref<1x128xf32, #tpu.memory_space<vmem>>, %arg6: memref<8x128xf32, #tpu.memory_space<vmem>>) attributes {dimension_semantics = [], scalar_prefetch = 0 : i64, scratch_operands = 0 : i64, tpu.core_type = #tpu.core_type<tc>} {
    %c0 = arith.constant 0 : index
    %c0_0 = arith.constant 0 : index
    %0 = vector.load %arg0[%c0, %c0_0] : memref<88x8xf32, #tpu.memory_space<vmem>>, vector<88x8xf32>
    %c0_1 = arith.constant 0 : index
    %c0_2 = arith.constant 0 : index
    %1 = vector.load %arg1[%c0_1, %c0_2] : memref<8x128xf32, #tpu.memory_space<vmem>>, vector<8x128xf32>
    %cst = arith.constant dense<0.000000e+00> : vector<88x128xf32>
    %2 = tpu.matmul %0, %1, %cst {dimension_numbers = #tpu.dot_dimension_numbers<[1], [0], [0], [1], [0, 0, 1, 1], [], []>} : vector<88x8xf32>, vector<8x128xf32>, vector<88x128xf32> -> vector<88x128xf32>
    %c0_3 = arith.constant 0 : index
    %c0_4 = arith.constant 0 : index
    %3 = vector.load %arg3[%c0_3, %c0_4] : memref<1x128xf32, #tpu.memory_space<vmem>>, vector<1x128xf32>
    %4 = vector.broadcast %3 : vector<1x128xf32> to vector<88x128xf32>
    %5 = arith.addf %2, %4 : vector<88x128xf32>
    %c0_5 = arith.constant 0 : index
    %c0_6 = arith.constant 0 : index
    %6 = vector.load %arg2[%c0_5, %c0_6] : memref<32x128xf32, #tpu.memory_space<vmem>>, vector<32x128xf32>
    %7 = tpu.iota {dimensions = array<i32: 1>} : vector<8x32xi32>
    %cst_7 = arith.constant 0.000000e+00 : f32
    %8 = vector.broadcast %cst_7 : f32 to vector<8x32xf32>
    %cst_8 = arith.constant 0.000000e+00 : f32
    %9 = vector.broadcast %cst_8 : f32 to vector<8x32xf32>
    %10 = vector.extract_strided_slice %5 {offsets = [0, 0], sizes = [8, 128], strides = [1, 1]} : vector<88x128xf32> to vector<8x128xf32>
    %cst_9 = arith.constant dense<0.000000e+00> : vector<8x128xf32>
    %11 = tpu.matmul %8, %6, %cst_9 {dimension_numbers = #tpu.dot_dimension_numbers<[1], [0], [0], [1], [0, 0, 1, 1], [], []>} : vector<8x32xf32>, vector<32x128xf32>, vector<8x128xf32> -> vector<8x128xf32>
    %12 = arith.addf %10, %11 : vector<8x128xf32>
    %13 = math.tanh %12 : vector<8x128xf32>
    %14 = vector.extract_strided_slice %13 {offsets = [0, 0], sizes = [8, 32], strides = [1, 1]} : vector<8x128xf32> to vector<8x32xf32>
    %cst_10 = arith.constant 5.000000e-01 : f32
    %15 = vector.broadcast %cst_10 : f32 to vector<8x32xf32>
    %16 = arith.mulf %15, %14 : vector<8x32xf32>
    %cst_11 = arith.constant 5.000000e-01 : f32
    %17 = vector.broadcast %cst_11 : f32 to vector<8x32xf32>
    %18 = arith.addf %16, %17 : vector<8x32xf32>
    %19 = vector.extract_strided_slice %13 {offsets = [0, 32], sizes = [8, 32], strides = [1, 1]} : vector<8x128xf32> to vector<8x32xf32>
    %cst_12 = arith.constant 5.000000e-01 : f32
    %20 = vector.broadcast %cst_12 : f32 to vector<8x32xf32>
    %21 = arith.mulf %20, %19 : vector<8x32xf32>
    %cst_13 = arith.constant 5.000000e-01 : f32
    %22 = vector.broadcast %cst_13 : f32 to vector<8x32xf32>
    %23 = arith.addf %21, %22 : vector<8x32xf32>
    %24 = vector.extract_strided_slice %13 {offsets = [0, 64], sizes = [8, 32], strides = [1, 1]} : vector<8x128xf32> to vector<8x32xf32>
    %25 = vector.extract_strided_slice %13 {offsets = [0, 96], sizes = [8, 32], strides = [1, 1]} : vector<8x128xf32> to vector<8x32xf32>
    %cst_14 = arith.constant 5.000000e-01 : f32
    %26 = vector.broadcast %cst_14 : f32 to vector<8x32xf32>
    %27 = arith.mulf %26, %25 : vector<8x32xf32>
    %cst_15 = arith.constant 5.000000e-01 : f32
    %28 = vector.broadcast %cst_15 : f32 to vector<8x32xf32>
    %29 = arith.addf %27, %28 : vector<8x32xf32>
    %30 = arith.mulf %23, %9 : vector<8x32xf32>
    %31 = arith.mulf %18, %24 : vector<8x32xf32>
    %32 = arith.addf %30, %31 : vector<8x32xf32>
    %33 = math.tanh %32 : vector<8x32xf32>
    %34 = arith.mulf %29, %33 : vector<8x32xf32>
    %c0_i32 = arith.constant 0 : i32
    %35 = vector.broadcast %c0_i32 : i32 to vector<8x32xi32>
    %36 = arith.cmpi sge, %7, %35 : vector<8x32xi32>
    %c8_i32 = arith.constant 8 : i32
    %37 = vector.broadcast %c8_i32 : i32 to vector<8x32xi32>
    %38 = arith.cmpi slt, %7, %37 : vector<8x32xi32>
    %39 = arith.andi %36, %38 : vector<8x32xi1>
    %40 = arith.select %39, %32, %9 : vector<8x32xi1>, vector<8x32xf32>
    %41 = arith.select %39, %34, %8 : vector<8x32xi1>, vector<8x32xf32>
    %42 = vector.extract_strided_slice %5 {offsets = [8, 0], sizes = [8, 128], strides = [1, 1]} : vector<88x128xf32> to vector<8x128xf32>
    %cst_16 = arith.constant dense<0.000000e+00> : vector<8x128xf32>
    %43 = tpu.matmul %41, %6, %cst_16 {dimension_numbers = #tpu.dot_dimension_numbers<[1], [0], [0], [1], [0, 0, 1, 1], [], []>} : vector<8x32xf32>, vector<32x128xf32>, vector<8x128xf32> -> vector<8x128xf32>
    %44 = arith.addf %42, %43 : vector<8x128xf32>
    %45 = math.tanh %44 : vector<8x128xf32>
    %46 = vector.extract_strided_slice %45 {offsets = [0, 0], sizes = [8, 32], strides = [1, 1]} : vector<8x128xf32> to vector<8x32xf32>
    %cst_17 = arith.constant 5.000000e-01 : f32
    %47 = vector.broadcast %cst_17 : f32 to vector<8x32xf32>
    %48 = arith.mulf %47, %46 : vector<8x32xf32>
    %cst_18 = arith.constant 5.000000e-01 : f32
    %49 = vector.broadcast %cst_18 : f32 to vector<8x32xf32>
    %50 = arith.addf %48, %49 : vector<8x32xf32>
    %51 = vector.extract_strided_slice %45 {offsets = [0, 32], sizes = [8, 32], strides = [1, 1]} : vector<8x128xf32> to vector<8x32xf32>
    %cst_19 = arith.constant 5.000000e-01 : f32
    %52 = vector.broadcast %cst_19 : f32 to vector<8x32xf32>
    %53 = arith.mulf %52, %51 : vector<8x32xf32>
    %cst_20 = arith.constant 5.000000e-01 : f32
    %54 = vector.broadcast %cst_20 : f32 to vector<8x32xf32>
    %55 = arith.addf %53, %54 : vector<8x32xf32>
    %56 = vector.extract_strided_slice %45 {offsets = [0, 64], sizes = [8, 32], strides = [1, 1]} : vector<8x128xf32> to vector<8x32xf32>
    %57 = vector.extract_strided_slice %45 {offsets = [0, 96], sizes = [8, 32], strides = [1, 1]} : vector<8x128xf32> to vector<8x32xf32>
    %cst_21 = arith.constant 5.000000e-01 : f32
    %58 = vector.broadcast %cst_21 : f32 to vector<8x32xf32>
    %59 = arith.mulf %58, %57 : vector<8x32xf32>
    %cst_22 = arith.constant 5.000000e-01 : f32
    %60 = vector.broadcast %cst_22 : f32 to vector<8x32xf32>
    %61 = arith.addf %59, %60 : vector<8x32xf32>
    %62 = arith.mulf %55, %40 : vector<8x32xf32>
    %63 = arith.mulf %50, %56 : vector<8x32xf32>
    %64 = arith.addf %62, %63 : vector<8x32xf32>
    %65 = math.tanh %64 : vector<8x32xf32>
    %66 = arith.mulf %61, %65 : vector<8x32xf32>
    %c0_i32_23 = arith.constant 0 : i32
    %67 = vector.broadcast %c0_i32_23 : i32 to vector<8x32xi32>
    %68 = arith.cmpi sge, %7, %67 : vector<8x32xi32>
    %c16_i32 = arith.constant 16 : i32
    %69 = vector.broadcast %c16_i32 : i32 to vector<8x32xi32>
    %70 = arith.cmpi slt, %7, %69 : vector<8x32xi32>
    %71 = arith.andi %68, %70 : vector<8x32xi1>
    %72 = arith.select %71, %64, %40 : vector<8x32xi1>, vector<8x32xf32>
    %73 = arith.select %71, %66, %41 : vector<8x32xi1>, vector<8x32xf32>
    %74 = vector.extract_strided_slice %5 {offsets = [16, 0], sizes = [8, 128], strides = [1, 1]} : vector<88x128xf32> to vector<8x128xf32>
    %cst_24 = arith.constant dense<0.000000e+00> : vector<8x128xf32>
    %75 = tpu.matmul %73, %6, %cst_24 {dimension_numbers = #tpu.dot_dimension_numbers<[1], [0], [0], [1], [0, 0, 1, 1], [], []>} : vector<8x32xf32>, vector<32x128xf32>, vector<8x128xf32> -> vector<8x128xf32>
    %76 = arith.addf %74, %75 : vector<8x128xf32>
    %77 = math.tanh %76 : vector<8x128xf32>
    %78 = vector.extract_strided_slice %77 {offsets = [0, 0], sizes = [8, 32], strides = [1, 1]} : vector<8x128xf32> to vector<8x32xf32>
    %cst_25 = arith.constant 5.000000e-01 : f32
    %79 = vector.broadcast %cst_25 : f32 to vector<8x32xf32>
    %80 = arith.mulf %79, %78 : vector<8x32xf32>
    %cst_26 = arith.constant 5.000000e-01 : f32
    %81 = vector.broadcast %cst_26 : f32 to vector<8x32xf32>
    %82 = arith.addf %80, %81 : vector<8x32xf32>
    %83 = vector.extract_strided_slice %77 {offsets = [0, 32], sizes = [8, 32], strides = [1, 1]} : vector<8x128xf32> to vector<8x32xf32>
    %cst_27 = arith.constant 5.000000e-01 : f32
    %84 = vector.broadcast %cst_27 : f32 to vector<8x32xf32>
    %85 = arith.mulf %84, %83 : vector<8x32xf32>
    %cst_28 = arith.constant 5.000000e-01 : f32
    %86 = vector.broadcast %cst_28 : f32 to vector<8x32xf32>
    %87 = arith.addf %85, %86 : vector<8x32xf32>
    %88 = vector.extract_strided_slice %77 {offsets = [0, 64], sizes = [8, 32], strides = [1, 1]} : vector<8x128xf32> to vector<8x32xf32>
    %89 = vector.extract_strided_slice %77 {offsets = [0, 96], sizes = [8, 32], strides = [1, 1]} : vector<8x128xf32> to vector<8x32xf32>
    %cst_29 = arith.constant 5.000000e-01 : f32
    %90 = vector.broadcast %cst_29 : f32 to vector<8x32xf32>
    %91 = arith.mulf %90, %89 : vector<8x32xf32>
    %cst_30 = arith.constant 5.000000e-01 : f32
    %92 = vector.broadcast %cst_30 : f32 to vector<8x32xf32>
    %93 = arith.addf %91, %92 : vector<8x32xf32>
    %94 = arith.mulf %87, %72 : vector<8x32xf32>
    %95 = arith.mulf %82, %88 : vector<8x32xf32>
    %96 = arith.addf %94, %95 : vector<8x32xf32>
    %97 = math.tanh %96 : vector<8x32xf32>
    %98 = arith.mulf %93, %97 : vector<8x32xf32>
    %c0_i32_31 = arith.constant 0 : i32
    %99 = vector.broadcast %c0_i32_31 : i32 to vector<8x32xi32>
    %100 = arith.cmpi sge, %7, %99 : vector<8x32xi32>
    %c24_i32 = arith.constant 24 : i32
    %101 = vector.broadcast %c24_i32 : i32 to vector<8x32xi32>
    %102 = arith.cmpi slt, %7, %101 : vector<8x32xi32>
    %103 = arith.andi %100, %102 : vector<8x32xi1>
    %104 = arith.select %103, %96, %72 : vector<8x32xi1>, vector<8x32xf32>
    %105 = arith.select %103, %98, %73 : vector<8x32xi1>, vector<8x32xf32>
    %106 = vector.extract_strided_slice %5 {offsets = [24, 0], sizes = [8, 128], strides = [1, 1]} : vector<88x128xf32> to vector<8x128xf32>
    %cst_32 = arith.constant dense<0.000000e+00> : vector<8x128xf32>
    %107 = tpu.matmul %105, %6, %cst_32 {dimension_numbers = #tpu.dot_dimension_numbers<[1], [0], [0], [1], [0, 0, 1, 1], [], []>} : vector<8x32xf32>, vector<32x128xf32>, vector<8x128xf32> -> vector<8x128xf32>
    %108 = arith.addf %106, %107 : vector<8x128xf32>
    %109 = math.tanh %108 : vector<8x128xf32>
    %110 = vector.extract_strided_slice %109 {offsets = [0, 0], sizes = [8, 32], strides = [1, 1]} : vector<8x128xf32> to vector<8x32xf32>
    %cst_33 = arith.constant 5.000000e-01 : f32
    %111 = vector.broadcast %cst_33 : f32 to vector<8x32xf32>
    %112 = arith.mulf %111, %110 : vector<8x32xf32>
    %cst_34 = arith.constant 5.000000e-01 : f32
    %113 = vector.broadcast %cst_34 : f32 to vector<8x32xf32>
    %114 = arith.addf %112, %113 : vector<8x32xf32>
    %115 = vector.extract_strided_slice %109 {offsets = [0, 32], sizes = [8, 32], strides = [1, 1]} : vector<8x128xf32> to vector<8x32xf32>
    %cst_35 = arith.constant 5.000000e-01 : f32
    %116 = vector.broadcast %cst_35 : f32 to vector<8x32xf32>
    %117 = arith.mulf %116, %115 : vector<8x32xf32>
    %cst_36 = arith.constant 5.000000e-01 : f32
    %118 = vector.broadcast %cst_36 : f32 to vector<8x32xf32>
    %119 = arith.addf %117, %118 : vector<8x32xf32>
    %120 = vector.extract_strided_slice %109 {offsets = [0, 64], sizes = [8, 32], strides = [1, 1]} : vector<8x128xf32> to vector<8x32xf32>
    %121 = vector.extract_strided_slice %109 {offsets = [0, 96], sizes = [8, 32], strides = [1, 1]} : vector<8x128xf32> to vector<8x32xf32>
    %cst_37 = arith.constant 5.000000e-01 : f32
    %122 = vector.broadcast %cst_37 : f32 to vector<8x32xf32>
    %123 = arith.mulf %122, %121 : vector<8x32xf32>
    %cst_38 = arith.constant 5.000000e-01 : f32
    %124 = vector.broadcast %cst_38 : f32 to vector<8x32xf32>
    %125 = arith.addf %123, %124 : vector<8x32xf32>
    %126 = arith.mulf %119, %104 : vector<8x32xf32>
    %127 = arith.mulf %114, %120 : vector<8x32xf32>
    %128 = arith.addf %126, %127 : vector<8x32xf32>
    %129 = math.tanh %128 : vector<8x32xf32>
    %130 = arith.mulf %125, %129 : vector<8x32xf32>
    %131 = vector.extract_strided_slice %5 {offsets = [32, 0], sizes = [8, 128], strides = [1, 1]} : vector<88x128xf32> to vector<8x128xf32>
    %cst_39 = arith.constant dense<0.000000e+00> : vector<8x128xf32>
    %132 = tpu.matmul %130, %6, %cst_39 {dimension_numbers = #tpu.dot_dimension_numbers<[1], [0], [0], [1], [0, 0, 1, 1], [], []>} : vector<8x32xf32>, vector<32x128xf32>, vector<8x128xf32> -> vector<8x128xf32>
    %133 = arith.addf %131, %132 : vector<8x128xf32>
    %134 = math.tanh %133 : vector<8x128xf32>
    %135 = vector.extract_strided_slice %134 {offsets = [0, 0], sizes = [8, 32], strides = [1, 1]} : vector<8x128xf32> to vector<8x32xf32>
    %cst_40 = arith.constant 5.000000e-01 : f32
    %136 = vector.broadcast %cst_40 : f32 to vector<8x32xf32>
    %137 = arith.mulf %136, %135 : vector<8x32xf32>
    %cst_41 = arith.constant 5.000000e-01 : f32
    %138 = vector.broadcast %cst_41 : f32 to vector<8x32xf32>
    %139 = arith.addf %137, %138 : vector<8x32xf32>
    %140 = vector.extract_strided_slice %134 {offsets = [0, 32], sizes = [8, 32], strides = [1, 1]} : vector<8x128xf32> to vector<8x32xf32>
    %cst_42 = arith.constant 5.000000e-01 : f32
    %141 = vector.broadcast %cst_42 : f32 to vector<8x32xf32>
    %142 = arith.mulf %141, %140 : vector<8x32xf32>
    %cst_43 = arith.constant 5.000000e-01 : f32
    %143 = vector.broadcast %cst_43 : f32 to vector<8x32xf32>
    %144 = arith.addf %142, %143 : vector<8x32xf32>
    %145 = vector.extract_strided_slice %134 {offsets = [0, 64], sizes = [8, 32], strides = [1, 1]} : vector<8x128xf32> to vector<8x32xf32>
    %146 = vector.extract_strided_slice %134 {offsets = [0, 96], sizes = [8, 32], strides = [1, 1]} : vector<8x128xf32> to vector<8x32xf32>
    %cst_44 = arith.constant 5.000000e-01 : f32
    %147 = vector.broadcast %cst_44 : f32 to vector<8x32xf32>
    %148 = arith.mulf %147, %146 : vector<8x32xf32>
    %cst_45 = arith.constant 5.000000e-01 : f32
    %149 = vector.broadcast %cst_45 : f32 to vector<8x32xf32>
    %150 = arith.addf %148, %149 : vector<8x32xf32>
    %151 = arith.mulf %144, %128 : vector<8x32xf32>
    %152 = arith.mulf %139, %145 : vector<8x32xf32>
    %153 = arith.addf %151, %152 : vector<8x32xf32>
    %154 = math.tanh %153 : vector<8x32xf32>
    %155 = arith.mulf %150, %154 : vector<8x32xf32>
    %156 = vector.extract_strided_slice %5 {offsets = [40, 0], sizes = [8, 128], strides = [1, 1]} : vector<88x128xf32> to vector<8x128xf32>
    %cst_46 = arith.constant dense<0.000000e+00> : vector<8x128xf32>
    %157 = tpu.matmul %155, %6, %cst_46 {dimension_numbers = #tpu.dot_dimension_numbers<[1], [0], [0], [1], [0, 0, 1, 1], [], []>} : vector<8x32xf32>, vector<32x128xf32>, vector<8x128xf32> -> vector<8x128xf32>
    %158 = arith.addf %156, %157 : vector<8x128xf32>
    %159 = math.tanh %158 : vector<8x128xf32>
    %160 = vector.extract_strided_slice %159 {offsets = [0, 0], sizes = [8, 32], strides = [1, 1]} : vector<8x128xf32> to vector<8x32xf32>
    %cst_47 = arith.constant 5.000000e-01 : f32
    %161 = vector.broadcast %cst_47 : f32 to vector<8x32xf32>
    %162 = arith.mulf %161, %160 : vector<8x32xf32>
    %cst_48 = arith.constant 5.000000e-01 : f32
    %163 = vector.broadcast %cst_48 : f32 to vector<8x32xf32>
    %164 = arith.addf %162, %163 : vector<8x32xf32>
    %165 = vector.extract_strided_slice %159 {offsets = [0, 32], sizes = [8, 32], strides = [1, 1]} : vector<8x128xf32> to vector<8x32xf32>
    %cst_49 = arith.constant 5.000000e-01 : f32
    %166 = vector.broadcast %cst_49 : f32 to vector<8x32xf32>
    %167 = arith.mulf %166, %165 : vector<8x32xf32>
    %cst_50 = arith.constant 5.000000e-01 : f32
    %168 = vector.broadcast %cst_50 : f32 to vector<8x32xf32>
    %169 = arith.addf %167, %168 : vector<8x32xf32>
    %170 = vector.extract_strided_slice %159 {offsets = [0, 64], sizes = [8, 32], strides = [1, 1]} : vector<8x128xf32> to vector<8x32xf32>
    %171 = vector.extract_strided_slice %159 {offsets = [0, 96], sizes = [8, 32], strides = [1, 1]} : vector<8x128xf32> to vector<8x32xf32>
    %cst_51 = arith.constant 5.000000e-01 : f32
    %172 = vector.broadcast %cst_51 : f32 to vector<8x32xf32>
    %173 = arith.mulf %172, %171 : vector<8x32xf32>
    %cst_52 = arith.constant 5.000000e-01 : f32
    %174 = vector.broadcast %cst_52 : f32 to vector<8x32xf32>
    %175 = arith.addf %173, %174 : vector<8x32xf32>
    %176 = arith.mulf %169, %153 : vector<8x32xf32>
    %177 = arith.mulf %164, %170 : vector<8x32xf32>
    %178 = arith.addf %176, %177 : vector<8x32xf32>
    %179 = math.tanh %178 : vector<8x32xf32>
    %180 = arith.mulf %175, %179 : vector<8x32xf32>
    %181 = vector.extract_strided_slice %5 {offsets = [48, 0], sizes = [8, 128], strides = [1, 1]} : vector<88x128xf32> to vector<8x128xf32>
    %cst_53 = arith.constant dense<0.000000e+00> : vector<8x128xf32>
    %182 = tpu.matmul %180, %6, %cst_53 {dimension_numbers = #tpu.dot_dimension_numbers<[1], [0], [0], [1], [0, 0, 1, 1], [], []>} : vector<8x32xf32>, vector<32x128xf32>, vector<8x128xf32> -> vector<8x128xf32>
    %183 = arith.addf %181, %182 : vector<8x128xf32>
    %184 = math.tanh %183 : vector<8x128xf32>
    %185 = vector.extract_strided_slice %184 {offsets = [0, 0], sizes = [8, 32], strides = [1, 1]} : vector<8x128xf32> to vector<8x32xf32>
    %cst_54 = arith.constant 5.000000e-01 : f32
    %186 = vector.broadcast %cst_54 : f32 to vector<8x32xf32>
    %187 = arith.mulf %186, %185 : vector<8x32xf32>
    %cst_55 = arith.constant 5.000000e-01 : f32
    %188 = vector.broadcast %cst_55 : f32 to vector<8x32xf32>
    %189 = arith.addf %187, %188 : vector<8x32xf32>
    %190 = vector.extract_strided_slice %184 {offsets = [0, 32], sizes = [8, 32], strides = [1, 1]} : vector<8x128xf32> to vector<8x32xf32>
    %cst_56 = arith.constant 5.000000e-01 : f32
    %191 = vector.broadcast %cst_56 : f32 to vector<8x32xf32>
    %192 = arith.mulf %191, %190 : vector<8x32xf32>
    %cst_57 = arith.constant 5.000000e-01 : f32
    %193 = vector.broadcast %cst_57 : f32 to vector<8x32xf32>
    %194 = arith.addf %192, %193 : vector<8x32xf32>
    %195 = vector.extract_strided_slice %184 {offsets = [0, 64], sizes = [8, 32], strides = [1, 1]} : vector<8x128xf32> to vector<8x32xf32>
    %196 = vector.extract_strided_slice %184 {offsets = [0, 96], sizes = [8, 32], strides = [1, 1]} : vector<8x128xf32> to vector<8x32xf32>
    %cst_58 = arith.constant 5.000000e-01 : f32
    %197 = vector.broadcast %cst_58 : f32 to vector<8x32xf32>
    %198 = arith.mulf %197, %196 : vector<8x32xf32>
    %cst_59 = arith.constant 5.000000e-01 : f32
    %199 = vector.broadcast %cst_59 : f32 to vector<8x32xf32>
    %200 = arith.addf %198, %199 : vector<8x32xf32>
    %201 = arith.mulf %194, %178 : vector<8x32xf32>
    %202 = arith.mulf %189, %195 : vector<8x32xf32>
    %203 = arith.addf %201, %202 : vector<8x32xf32>
    %204 = math.tanh %203 : vector<8x32xf32>
    %205 = arith.mulf %200, %204 : vector<8x32xf32>
    %206 = vector.extract_strided_slice %5 {offsets = [56, 0], sizes = [8, 128], strides = [1, 1]} : vector<88x128xf32> to vector<8x128xf32>
    %cst_60 = arith.constant dense<0.000000e+00> : vector<8x128xf32>
    %207 = tpu.matmul %205, %6, %cst_60 {dimension_numbers = #tpu.dot_dimension_numbers<[1], [0], [0], [1], [0, 0, 1, 1], [], []>} : vector<8x32xf32>, vector<32x128xf32>, vector<8x128xf32> -> vector<8x128xf32>
    %208 = arith.addf %206, %207 : vector<8x128xf32>
    %209 = math.tanh %208 : vector<8x128xf32>
    %210 = vector.extract_strided_slice %209 {offsets = [0, 0], sizes = [8, 32], strides = [1, 1]} : vector<8x128xf32> to vector<8x32xf32>
    %cst_61 = arith.constant 5.000000e-01 : f32
    %211 = vector.broadcast %cst_61 : f32 to vector<8x32xf32>
    %212 = arith.mulf %211, %210 : vector<8x32xf32>
    %cst_62 = arith.constant 5.000000e-01 : f32
    %213 = vector.broadcast %cst_62 : f32 to vector<8x32xf32>
    %214 = arith.addf %212, %213 : vector<8x32xf32>
    %215 = vector.extract_strided_slice %209 {offsets = [0, 32], sizes = [8, 32], strides = [1, 1]} : vector<8x128xf32> to vector<8x32xf32>
    %cst_63 = arith.constant 5.000000e-01 : f32
    %216 = vector.broadcast %cst_63 : f32 to vector<8x32xf32>
    %217 = arith.mulf %216, %215 : vector<8x32xf32>
    %cst_64 = arith.constant 5.000000e-01 : f32
    %218 = vector.broadcast %cst_64 : f32 to vector<8x32xf32>
    %219 = arith.addf %217, %218 : vector<8x32xf32>
    %220 = vector.extract_strided_slice %209 {offsets = [0, 64], sizes = [8, 32], strides = [1, 1]} : vector<8x128xf32> to vector<8x32xf32>
    %221 = vector.extract_strided_slice %209 {offsets = [0, 96], sizes = [8, 32], strides = [1, 1]} : vector<8x128xf32> to vector<8x32xf32>
    %cst_65 = arith.constant 5.000000e-01 : f32
    %222 = vector.broadcast %cst_65 : f32 to vector<8x32xf32>
    %223 = arith.mulf %222, %221 : vector<8x32xf32>
    %cst_66 = arith.constant 5.000000e-01 : f32
    %224 = vector.broadcast %cst_66 : f32 to vector<8x32xf32>
    %225 = arith.addf %223, %224 : vector<8x32xf32>
    %226 = arith.mulf %219, %203 : vector<8x32xf32>
    %227 = arith.mulf %214, %220 : vector<8x32xf32>
    %228 = arith.addf %226, %227 : vector<8x32xf32>
    %229 = math.tanh %228 : vector<8x32xf32>
    %230 = arith.mulf %225, %229 : vector<8x32xf32>
    %231 = vector.extract_strided_slice %5 {offsets = [64, 0], sizes = [8, 128], strides = [1, 1]} : vector<88x128xf32> to vector<8x128xf32>
    %cst_67 = arith.constant dense<0.000000e+00> : vector<8x128xf32>
    %232 = tpu.matmul %230, %6, %cst_67 {dimension_numbers = #tpu.dot_dimension_numbers<[1], [0], [0], [1], [0, 0, 1, 1], [], []>} : vector<8x32xf32>, vector<32x128xf32>, vector<8x128xf32> -> vector<8x128xf32>
    %233 = arith.addf %231, %232 : vector<8x128xf32>
    %234 = math.tanh %233 : vector<8x128xf32>
    %235 = vector.extract_strided_slice %234 {offsets = [0, 0], sizes = [8, 32], strides = [1, 1]} : vector<8x128xf32> to vector<8x32xf32>
    %cst_68 = arith.constant 5.000000e-01 : f32
    %236 = vector.broadcast %cst_68 : f32 to vector<8x32xf32>
    %237 = arith.mulf %236, %235 : vector<8x32xf32>
    %cst_69 = arith.constant 5.000000e-01 : f32
    %238 = vector.broadcast %cst_69 : f32 to vector<8x32xf32>
    %239 = arith.addf %237, %238 : vector<8x32xf32>
    %240 = vector.extract_strided_slice %234 {offsets = [0, 32], sizes = [8, 32], strides = [1, 1]} : vector<8x128xf32> to vector<8x32xf32>
    %cst_70 = arith.constant 5.000000e-01 : f32
    %241 = vector.broadcast %cst_70 : f32 to vector<8x32xf32>
    %242 = arith.mulf %241, %240 : vector<8x32xf32>
    %cst_71 = arith.constant 5.000000e-01 : f32
    %243 = vector.broadcast %cst_71 : f32 to vector<8x32xf32>
    %244 = arith.addf %242, %243 : vector<8x32xf32>
    %245 = vector.extract_strided_slice %234 {offsets = [0, 64], sizes = [8, 32], strides = [1, 1]} : vector<8x128xf32> to vector<8x32xf32>
    %246 = vector.extract_strided_slice %234 {offsets = [0, 96], sizes = [8, 32], strides = [1, 1]} : vector<8x128xf32> to vector<8x32xf32>
    %cst_72 = arith.constant 5.000000e-01 : f32
    %247 = vector.broadcast %cst_72 : f32 to vector<8x32xf32>
    %248 = arith.mulf %247, %246 : vector<8x32xf32>
    %cst_73 = arith.constant 5.000000e-01 : f32
    %249 = vector.broadcast %cst_73 : f32 to vector<8x32xf32>
    %250 = arith.addf %248, %249 : vector<8x32xf32>
    %251 = arith.mulf %244, %228 : vector<8x32xf32>
    %252 = arith.mulf %239, %245 : vector<8x32xf32>
    %253 = arith.addf %251, %252 : vector<8x32xf32>
    %254 = math.tanh %253 : vector<8x32xf32>
    %255 = arith.mulf %250, %254 : vector<8x32xf32>
    %c8_i32_74 = arith.constant 8 : i32
    %256 = vector.broadcast %c8_i32_74 : i32 to vector<8x32xi32>
    %257 = arith.cmpi sge, %7, %256 : vector<8x32xi32>
    %c32_i32 = arith.constant 32 : i32
    %258 = vector.broadcast %c32_i32 : i32 to vector<8x32xi32>
    %259 = arith.cmpi slt, %7, %258 : vector<8x32xi32>
    %260 = arith.andi %257, %259 : vector<8x32xi1>
    %261 = arith.select %260, %253, %228 : vector<8x32xi1>, vector<8x32xf32>
    %262 = arith.select %260, %255, %230 : vector<8x32xi1>, vector<8x32xf32>
    %263 = vector.extract_strided_slice %5 {offsets = [72, 0], sizes = [8, 128], strides = [1, 1]} : vector<88x128xf32> to vector<8x128xf32>
    %cst_75 = arith.constant dense<0.000000e+00> : vector<8x128xf32>
    %264 = tpu.matmul %262, %6, %cst_75 {dimension_numbers = #tpu.dot_dimension_numbers<[1], [0], [0], [1], [0, 0, 1, 1], [], []>} : vector<8x32xf32>, vector<32x128xf32>, vector<8x128xf32> -> vector<8x128xf32>
    %265 = arith.addf %263, %264 : vector<8x128xf32>
    %266 = math.tanh %265 : vector<8x128xf32>
    %267 = vector.extract_strided_slice %266 {offsets = [0, 0], sizes = [8, 32], strides = [1, 1]} : vector<8x128xf32> to vector<8x32xf32>
    %cst_76 = arith.constant 5.000000e-01 : f32
    %268 = vector.broadcast %cst_76 : f32 to vector<8x32xf32>
    %269 = arith.mulf %268, %267 : vector<8x32xf32>
    %cst_77 = arith.constant 5.000000e-01 : f32
    %270 = vector.broadcast %cst_77 : f32 to vector<8x32xf32>
    %271 = arith.addf %269, %270 : vector<8x32xf32>
    %272 = vector.extract_strided_slice %266 {offsets = [0, 32], sizes = [8, 32], strides = [1, 1]} : vector<8x128xf32> to vector<8x32xf32>
    %cst_78 = arith.constant 5.000000e-01 : f32
    %273 = vector.broadcast %cst_78 : f32 to vector<8x32xf32>
    %274 = arith.mulf %273, %272 : vector<8x32xf32>
    %cst_79 = arith.constant 5.000000e-01 : f32
    %275 = vector.broadcast %cst_79 : f32 to vector<8x32xf32>
    %276 = arith.addf %274, %275 : vector<8x32xf32>
    %277 = vector.extract_strided_slice %266 {offsets = [0, 64], sizes = [8, 32], strides = [1, 1]} : vector<8x128xf32> to vector<8x32xf32>
    %278 = vector.extract_strided_slice %266 {offsets = [0, 96], sizes = [8, 32], strides = [1, 1]} : vector<8x128xf32> to vector<8x32xf32>
    %cst_80 = arith.constant 5.000000e-01 : f32
    %279 = vector.broadcast %cst_80 : f32 to vector<8x32xf32>
    %280 = arith.mulf %279, %278 : vector<8x32xf32>
    %cst_81 = arith.constant 5.000000e-01 : f32
    %281 = vector.broadcast %cst_81 : f32 to vector<8x32xf32>
    %282 = arith.addf %280, %281 : vector<8x32xf32>
    %283 = arith.mulf %276, %261 : vector<8x32xf32>
    %284 = arith.mulf %271, %277 : vector<8x32xf32>
    %285 = arith.addf %283, %284 : vector<8x32xf32>
    %286 = math.tanh %285 : vector<8x32xf32>
    %287 = arith.mulf %282, %286 : vector<8x32xf32>
    %c16_i32_82 = arith.constant 16 : i32
    %288 = vector.broadcast %c16_i32_82 : i32 to vector<8x32xi32>
    %289 = arith.cmpi sge, %7, %288 : vector<8x32xi32>
    %c32_i32_83 = arith.constant 32 : i32
    %290 = vector.broadcast %c32_i32_83 : i32 to vector<8x32xi32>
    %291 = arith.cmpi slt, %7, %290 : vector<8x32xi32>
    %292 = arith.andi %289, %291 : vector<8x32xi1>
    %293 = arith.select %292, %285, %261 : vector<8x32xi1>, vector<8x32xf32>
    %294 = arith.select %292, %287, %262 : vector<8x32xi1>, vector<8x32xf32>
    %295 = vector.extract_strided_slice %5 {offsets = [80, 0], sizes = [8, 128], strides = [1, 1]} : vector<88x128xf32> to vector<8x128xf32>
    %cst_84 = arith.constant dense<0.000000e+00> : vector<8x128xf32>
    %296 = tpu.matmul %294, %6, %cst_84 {dimension_numbers = #tpu.dot_dimension_numbers<[1], [0], [0], [1], [0, 0, 1, 1], [], []>} : vector<8x32xf32>, vector<32x128xf32>, vector<8x128xf32> -> vector<8x128xf32>
    %297 = arith.addf %295, %296 : vector<8x128xf32>
    %298 = math.tanh %297 : vector<8x128xf32>
    %299 = vector.extract_strided_slice %298 {offsets = [0, 0], sizes = [8, 32], strides = [1, 1]} : vector<8x128xf32> to vector<8x32xf32>
    %cst_85 = arith.constant 5.000000e-01 : f32
    %300 = vector.broadcast %cst_85 : f32 to vector<8x32xf32>
    %301 = arith.mulf %300, %299 : vector<8x32xf32>
    %cst_86 = arith.constant 5.000000e-01 : f32
    %302 = vector.broadcast %cst_86 : f32 to vector<8x32xf32>
    %303 = arith.addf %301, %302 : vector<8x32xf32>
    %304 = vector.extract_strided_slice %298 {offsets = [0, 32], sizes = [8, 32], strides = [1, 1]} : vector<8x128xf32> to vector<8x32xf32>
    %cst_87 = arith.constant 5.000000e-01 : f32
    %305 = vector.broadcast %cst_87 : f32 to vector<8x32xf32>
    %306 = arith.mulf %305, %304 : vector<8x32xf32>
    %cst_88 = arith.constant 5.000000e-01 : f32
    %307 = vector.broadcast %cst_88 : f32 to vector<8x32xf32>
    %308 = arith.addf %306, %307 : vector<8x32xf32>
    %309 = vector.extract_strided_slice %298 {offsets = [0, 64], sizes = [8, 32], strides = [1, 1]} : vector<8x128xf32> to vector<8x32xf32>
    %310 = vector.extract_strided_slice %298 {offsets = [0, 96], sizes = [8, 32], strides = [1, 1]} : vector<8x128xf32> to vector<8x32xf32>
    %cst_89 = arith.constant 5.000000e-01 : f32
    %311 = vector.broadcast %cst_89 : f32 to vector<8x32xf32>
    %312 = arith.mulf %311, %310 : vector<8x32xf32>
    %cst_90 = arith.constant 5.000000e-01 : f32
    %313 = vector.broadcast %cst_90 : f32 to vector<8x32xf32>
    %314 = arith.addf %312, %313 : vector<8x32xf32>
    %315 = arith.mulf %308, %293 : vector<8x32xf32>
    %316 = arith.mulf %303, %309 : vector<8x32xf32>
    %317 = arith.addf %315, %316 : vector<8x32xf32>
    %318 = math.tanh %317 : vector<8x32xf32>
    %319 = arith.mulf %314, %318 : vector<8x32xf32>
    %c24_i32_91 = arith.constant 24 : i32
    %320 = vector.broadcast %c24_i32_91 : i32 to vector<8x32xi32>
    %321 = arith.cmpi sge, %7, %320 : vector<8x32xi32>
    %c32_i32_92 = arith.constant 32 : i32
    %322 = vector.broadcast %c32_i32_92 : i32 to vector<8x32xi32>
    %323 = arith.cmpi slt, %7, %322 : vector<8x32xi32>
    %324 = arith.andi %321, %323 : vector<8x32xi1>
    %325 = arith.select %324, %319, %294 : vector<8x32xi1>, vector<8x32xf32>
    %326 = vector.extract_strided_slice %325 {offsets = [0, 24], sizes = [8, 8], strides = [1, 1]} : vector<8x32xf32> to vector<8x8xf32>
    %c0_93 = arith.constant 0 : index
    %c0_94 = arith.constant 0 : index
    %327 = vector.load %arg4[%c0_93, %c0_94] : memref<8x128xf32, #tpu.memory_space<vmem>>, vector<8x128xf32>
    %cst_95 = arith.constant dense<0.000000e+00> : vector<8x128xf32>
    %328 = tpu.matmul %326, %327, %cst_95 {dimension_numbers = #tpu.dot_dimension_numbers<[1], [0], [0], [1], [0, 0, 1, 1], [], []>} : vector<8x8xf32>, vector<8x128xf32>, vector<8x128xf32> -> vector<8x128xf32>
    %c0_96 = arith.constant 0 : index
    %c0_97 = arith.constant 0 : index
    %329 = vector.load %arg5[%c0_96, %c0_97] : memref<1x128xf32, #tpu.memory_space<vmem>>, vector<1x128xf32>
    %330 = vector.broadcast %329 : vector<1x128xf32> to vector<8x128xf32>
    %331 = arith.addf %328, %330 : vector<8x128xf32>
    %c0_98 = arith.constant 0 : index
    %c0_99 = arith.constant 0 : index
    %332 = vector.load %arg6[%c0_98, %c0_99] : memref<8x128xf32, #tpu.memory_space<vmem>>, vector<8x128xf32>
    tpu.vector_store %arg6[%c0_98, %c0_99], %331 {strides = array<i32>} : memref<8x128xf32, #tpu.memory_space<vmem>>, vector<8x128xf32>,
    return
  }
}

</mosaic_0001>

<bundles_post_ra>
// kernel: lstm_model_forward.1
= control target key start
LH: loop header
LB: loop body
LE: loop exit
PB: predicated region body
PF: predicated region fallthrough
CT: control target
= control target key end

     0   :  { %vm39_vm0 = vcmask 64512   ;;  %v829_v8 = vmov 0.0   ;;  %s830_s13 = smov 64   ;;  %s831_s14 = smov 32   ;;  %v127_v25 = vlaneseq  ;;  %vm129_vm2 = vcmask 261120   ;;  %s1105_s1 = inlined_call_operand.vmem [shape: f32[8,128], index: 1, kind: input, shape index: {}]   ;;  %s1106_s0 = inlined_call_operand.vmem [shape: f32[88,8], index: 0, kind: input, shape index: {}]   ;;  %s1107_s2 = inlined_call_operand.vmem [shape: f32[32,128], index: 2, kind: input, shape index: {}]   ;;  %s1108_s3 = inlined_call_operand.vmem [shape: f32[1,128], index: 3, kind: input, shape index: {}]   ;;  %s1109_s4 = inlined_call_operand.vmem [shape: f32[8,128], index: 4, kind: input, shape index: {}]   ;;  %s1110_s5 = inlined_call_operand.vmem [shape: f32[1,128], index: 5, kind: input, shape index: {}]   ;;  %s1111_s6 = inlined_call_operand.vmem [shape: f32[8,128], index: 6, kind: output, shape index: {}]  }
   0x1   :  { %v34_v0 = vld [vmem:[%s1105_s1] sm:$0xff]  ;;  %v29_v1 = vld [vmem:[%s1106_s0 + $0x30] sm:$0xff]  ;;  %v878_v2 = vld [vmem:[%s1107_s2 + $0x18] sm:$0xff]  ;;  %s833_s7 = smov 104  }
   0x2   :  { %775 = vmatpush.msra.mxu1 %v34_v0  ;;  %88 = vmatpush.msra.mxu0 %v34_v0  ;;  %v884_v3 = vld [vmem:[%s1107_s2 + $0x10] sm:$0xff]  ;;  %v23_v4 = vld [vmem:[%s1106_s0] sm:$0xff]  ;;  %v894_v5 = vld [vmem:[%s1107_s2 + $0x8] sm:$0xff]  ;;  %v938_v26 = vand.u32 127, %v127_v25 }
   0x3   :  { %759 = vmatmul.msk.f32.vlgmr.msra.gmra.mxu1 %vm39_vm0, %v29_v1  ;;  %776 = vmatpush.msra.mxu2 %v34_v0  ;;  %v902_v6 = vld [vmem:[%s1107_s2] sm:$0xff]  ;;  %v30_v7 = vld [vmem:[%s1106_s0 + $0x38] sm:$0xff]  ;;  %v32_v32 = vld [vmem:[%s1106_s0 + $0x48] sm:$0xff] }
   0x4   :  { %145 = vmatpush.msrb.mxu1 %v878_v2  ;;  %753 = vmatmul.msk.f32.vlgmr.msra.gmra.mxu0 %vm39_vm0, %v23_v4  ;;  %v931_v12 = vld [vmem:[%s1108_s3] ss:$0 sm:$0xff]  ;;  %s832_s3 = smov 96   ;;  %vm175_vm1 = vcmp.lt.s32.totalorder %v938_v26, 8  ;;  %v24_v33 = vld [vmem:[%s1106_s0 + $0x8] sm:$0xff]  ;;  %v33_v52 = vld [vmem:[%s1106_s0 + $0x50] sm:$0xff] }
   0x5   :  { %202 = vmatpush.msrb.mxu2 %v878_v2  ;;  %777 = vmatpush.msra.mxu3 %v34_v0  ;;  %v31_v31 = vld [vmem:[%s1106_s0 + $0x40] sm:$0xff]  ;;  %vm235_vm3 = vcmp.lt.s32.totalorder %v938_v26, 16  ;;  %v25_v57 = vld [vmem:[%s1106_s0 + $0x10] sm:$0xff]  ;;  %vm295_vm4 = vcmp.lt.s32.totalorder %v938_v26, 24  ;;  %vm585_vm5 = vcmp.ge.s32.totalorder %v938_v26, 8  ;;  %vm586_vm6 = vcmp.lt.s32.totalorder %v938_v26, 32 }
   0x6   :  { %146 = vmatpush.msrb.mxu1 %v884_v3  ;;  %761 = vmatmul.msk.f32.vlgmr.msra.gmra.mxu2 %vm39_vm0, %v31_v31  ;;  %vm587_vm7 = vmand %vm585_vm5, %vm586_vm6  ;;  %vm651_vm8 = vcmp.ge.s32.totalorder %v938_v26, 16  ;;  %vm711_vm10 = vcmp.ge.s32.totalorder %v938_v26, 24 }
   0x7   :  { %262 = vmatpush.msrb.mxu3 %v878_v2  ;;  %203 = vmatpush.msrb.mxu2 %v884_v3  ;;  %vm652_vm9 = vmand %vm651_vm8, %vm586_vm6 }
   0x8   :  { %147 = vmatpush.msrb.mxu1 %v894_v5  ;;  %763 = vmatmul.msk.f32.vlgmr.msra.gmra.mxu3 %vm39_vm0, %v33_v52  ;;  %vm712_vm11 = vmand %vm711_vm10, %vm586_vm6 }
   0x9   :  { %263 = vmatpush.msrb.mxu3 %v884_v3  ;;  %204 = vmatpush.msrb.mxu2 %v894_v5 }
   0xa   :  { %148 = vmatpush.msrb.mxu1 %v902_v6 }
   0xb   :  { %264 = vmatpush.msrb.mxu3 %v894_v5  ;;  %760 = vmatmul.msk.f32.gmra.mxu1 %vm39_vm0, %v30_v7 }
   0xc   :  { %205 = vmatpush.msrb.mxu2 %v902_v6  ;;  %322 = vmatpush.msra.mxu1 %v878_v2 }
   0xd   :  { %265 = vmatpush.msrb.mxu3 %v902_v6  ;;  %754 = vmatmul.msk.f32.gmra.mxu0 %vm39_vm0, %v24_v33 }
   0xe   :  { %323 = vmatpush.msra.mxu1 %v884_v3  ;;  %372 = vmatpush.msra.mxu2 %v878_v2 }
   0xf   :  { %762 = vmatmul.msk.f32.gmra.mxu2 %vm39_vm0, %v32_v32  ;;  %418 = vmatpush.msra.mxu3 %v878_v2 }
  0x10   :  { %324 = vmatpush.msra.mxu1 %v894_v5  ;;  %373 = vmatpush.msra.mxu2 %v884_v3 }
  0x11   :  { %419 = vmatpush.msra.mxu3 %v884_v3 }
  0x12   :  { %325 = vmatpush.msra.mxu1 %v902_v6  ;;  %374 = vmatpush.msra.mxu2 %v894_v5 }
  0x13   :  { %149 = vmatmul.f32.vlgmr.msrb.gmra.mxu1 %v829_v8  ;;  %420 = vmatpush.msra.mxu3 %v894_v5 }
  0x14   :  { %464 = vmatpush.msrb.mxu1 %v878_v2  ;;  %375 = vmatpush.msra.mxu2 %v902_v6 }
  0x15   :  { %421 = vmatpush.msra.mxu3 %v902_v6  ;;  %755 = vmatmul.msk.f32.gmra.mxu0 %vm39_vm0, %v25_v57  ;;  %v28_v57 = vld [vmem:[%s1106_s0 + $0x28] sm:$0xff] }
  0x16   :  { %465 = vmatpush.msrb.mxu1 %v884_v3 }
  0x18   :  { %466 = vmatpush.msrb.mxu1 %v894_v5 }
  0x1a   :  { %467 = vmatpush.msrb.mxu1 %v902_v6 }
  0x80   :  { %v924_v9 = vpop.f32.mrf.mxu1 }
  0x81   :  { %v90_v11 = vpop.f32.mrf.mxu0 }
  0x82   :  { %v91_v13 = vadd.f32 %v931_v12, %v90_v11 }
  0x88   :  { %v926_v10 = vpop.f32.mrf.mxu1 }
  0x89   :  { %v968_v36 = vpop.f32.mrf.mxu2 }
  0x8a   :  { %v93_v38 = vpop.f32.mrf.mxu0 }
  0x8b   :  { %v94_v39 = vadd.f32 %v931_v12, %v93_v38  ;;  %v997_v60 = vpop.f32.mrf.mxu3 }
  0x90   :  { %v150_v14 = vpop.f32.mrf.mxu1 }
  0x91   :  { %v153_v15 = vadd.f32 %v150_v14, %v91_v13 }
  0x92   :  { %v970_v37 = vpop.f32.mrf.mxu2  ;;  %v96_v61 = vpop.f32.mrf.mxu0 }
  0x93   :  { %785 = vtanh.f32 %v153_v15  ;;  %v97_v62 = vadd.f32 %v931_v12, %v96_v61 }
  0x99   :  { %v786_v16 = vpop.eup %785 }
  0x9a   :  { %159 = vrot.lane.b32.xlu0 %v786_v16, %s830_s13  ;;  %v155_v17 = vmul.f32 0.5, %v786_v16 }
  0x9c   :  { %v156_v18 = vadd.f32 0.5, %v155_v17 }
  0x9e   :  { %v157_v21 = vmul.f32 0.0, %v156_v18 }
 0x10c   :  { %v160_v19 = vpop.permute.xlu0 %159 }
 0x10d   :  { %v162_v20 = vmul.f32 %v160_v19, %v156_v18 }
 0x10f   :  { %164 = vrot.lane.b32.xlu0 %v162_v20, %s831_s14 }
 0x181   :  { %v165_v22 = vpop.permute.xlu0 %164 }
 0x182   :  { %v167_v23 = vadd.f32 %v165_v22, %v157_v21 }
 0x184   :  { %787 = vtanh.f32 %v167_v23  ;;  %178 = vrot.lane.b32.xlu2 %v167_v23, %s832_s3 }
 0x18a   :  { %v788_v24 = vpop.eup %787 }
 0x18b   :  { %170 = vrot.lane.b32.xlu1 %v788_v24, %s830_s13 }
 0x1de   :  { %v179_v27 = vpop.permute.xlu2 %178 }
 0x1df   :  { %v181_v28 = vsel %vm175_vm1, %v179_v27, 0.0 }
 0x1e0   :  { %215 = vrot.lane.b32.xlu0 %v181_v28, %s831_s14 }
 0x1fd   :  { %v171_v29 = vpop.permute.xlu1 %170 }
 0x1fe   :  { %v173_v30 = vmul.f32 %v171_v29, %v156_v18  ;;  %v26_v18 = vld [vmem:[%s1106_s0 + $0x18] sm:$0xff] }
 0x1ff   :  { %756 = vmatmul.msk.f32.gmra.mxu0 %vm39_vm0, %v26_v18 }
 0x200   :  { %183 = vrot.lane.b32.xlu1 %v173_v30, %s831_s14 }
 0x252   :  { %v216_v47 = vpop.permute.xlu0 %215 }
 0x272   :  { %v184_v34 = vpop.permute.xlu1 %183 }
 0x273   :  { %v186_v35 = vsel %vm175_vm1, %v184_v34, 0.0 }
 0x274   :  { %764 = vmatmul.msk.f32.vlgmr.msrb.gmra.mxu2 %vm129_vm2, %v186_v35 }
 0x275   :  { %510 = vmatpush.msrb.mxu2 %v878_v2 }
 0x277   :  { %511 = vmatpush.msrb.mxu2 %v884_v3 }
 0x279   :  { %512 = vmatpush.msrb.mxu2 %v894_v5 }
 0x27b   :  { %513 = vmatpush.msrb.mxu2 %v902_v6 }
 0x27c   :  { %v99_v25 = vpop.f32.mrf.mxu0 }
 0x27d   :  { %v100_v27 = vadd.f32 %v931_v12, %v99_v25 }
 0x2f7   :  { %v207_v40 = vpop.f32.mrf.mxu2 }
 0x2f8   :  { %v210_v41 = vadd.f32 %v207_v40, %v94_v39 }
 0x2fa   :  { %789 = vtanh.f32 %v210_v41 }
 0x300   :  { %v790_v42 = vpop.eup %789 }
 0x301   :  { %220 = vrot.lane.b32.xlu2 %v790_v42, %s830_s13  ;;  %v212_v43 = vmul.f32 0.5, %v790_v42 }
 0x303   :  { %v213_v44 = vadd.f32 0.5, %v212_v43 }
 0x305   :  { %v218_v48 = vmul.f32 %v216_v47, %v213_v44 }
 0x35b   :  { %v221_v45 = vpop.permute.xlu2 %220 }
 0x35c   :  { %v223_v46 = vmul.f32 %v221_v45, %v213_v44 }
 0x35e   :  { %225 = vrot.lane.b32.xlu1 %v223_v46, %s831_s14 }
 0x3d0   :  { %v226_v49 = vpop.permute.xlu1 %225 }
 0x3d1   :  { %v228_v50 = vadd.f32 %v226_v49, %v218_v48 }
 0x3d3   :  { %791 = vtanh.f32 %v228_v50  ;;  %238 = vrot.lane.b32.xlu1 %v228_v50, %s832_s3 }
 0x3d9   :  { %v792_v51 = vpop.eup %791 }
 0x3da   :  { %231 = vrot.lane.b32.xlu2 %v792_v51, %s830_s13 }
 0x434   :  { %v232_v53 = vpop.permute.xlu2 %231 }
 0x435   :  { %v234_v54 = vmul.f32 %v232_v53, %v213_v44  ;;  %v27_v44 = vld [vmem:[%s1106_s0 + $0x20] sm:$0xff] }
 0x436   :  { %757 = vmatmul.msk.f32.gmra.mxu0 %vm39_vm0, %v27_v44 }
 0x437   :  { %243 = vrot.lane.b32.xlu0 %v234_v54, %s831_s14 }
 0x43e   :  { %758 = vmatmul.msk.f32.gmra.mxu0 %vm39_vm0, %v28_v57 }
 0x445   :  { %v239_v55 = vpop.permute.xlu1 %238 }
 0x446   :  { %v241_v56 = vsel %vm235_vm3, %v239_v55, %v181_v28 }
 0x447   :  { %275 = vrot.lane.b32.xlu0 %v241_v56, %s831_s14 }
 0x4a9   :  { %v244_v58 = vpop.permute.xlu0 %243 }
 0x4aa   :  { %v246_v59 = vsel %vm235_vm3, %v244_v58, %v186_v35 }
 0x4ab   :  { %765 = vmatmul.msk.f32.vlgmr.msrb.gmra.mxu3 %vm129_vm2, %v246_v59 }
 0x4ac   :  { %556 = vmatpush.msrb.mxu3 %v878_v2 }
 0x4ae   :  { %557 = vmatpush.msrb.mxu3 %v884_v3 }
 0x4b0   :  { %558 = vmatpush.msrb.mxu3 %v894_v5 }
 0x4b2   :  { %559 = vmatpush.msrb.mxu3 %v902_v6 }
 0x4b3   :  { %v102_v46 = vpop.f32.mrf.mxu0 }
 0x4b4   :  { %v103_v47 = vadd.f32 %v931_v12, %v102_v46 }
 0x4b9   :  { %v276_v13 = vpop.permute.xlu0 %275 }
 0x52e   :  { %v267_v63 = vpop.f32.mrf.mxu3 }
 0x52f   :  { %v270_v0 = vadd.f32 %v267_v63, %v97_v62 }
 0x531   :  { %793 = vtanh.f32 %v270_v0 }
 0x537   :  { %v794_v1 = vpop.eup %793 }
 0x538   :  { %280 = vrot.lane.b32.xlu2 %v794_v1, %s830_s13  ;;  %v272_v4 = vmul.f32 0.5, %v794_v1 }
 0x53a   :  { %v273_v7 = vadd.f32 0.5, %v272_v4 }
 0x53c   :  { %v278_v14 = vmul.f32 %v276_v13, %v273_v7 }
 0x592   :  { %v281_v8 = vpop.permute.xlu2 %280 }
 0x593   :  { %v283_v11 = vmul.f32 %v281_v8, %v273_v7 }
 0x595   :  { %285 = vrot.lane.b32.xlu1 %v283_v11, %s831_s14 }
 0x607   :  { %v286_v15 = vpop.permute.xlu1 %285 }
 0x608   :  { %v288_v16 = vadd.f32 %v286_v15, %v278_v14 }
 0x60a   :  { %795 = vtanh.f32 %v288_v16  ;;  %298 = vrot.lane.b32.xlu1 %v288_v16, %s832_s3 }
 0x610   :  { %v796_v17 = vpop.eup %795 }
 0x611   :  { %291 = vrot.lane.b32.xlu2 %v796_v17, %s830_s13 }
 0x66b   :  { %v292_v19 = vpop.permute.xlu2 %291 }
 0x66c   :  { %v294_v20 = vmul.f32 %v292_v19, %v273_v7  ;;  %v109_v19 = vadd.f32 %v931_v12, %v924_v9 }
 0x66e   :  { %303 = vrot.lane.b32.xlu0 %v294_v20, %s831_s14 }
 0x67c   :  { %v299_v21 = vpop.permute.xlu1 %298 }
 0x67d   :  { %v301_v22 = vsel %vm295_vm4, %v299_v21, %v241_v56 }
 0x67e   :  { %335 = vrot.lane.b32.xlu0 %v301_v22, %s831_s14 }
 0x6e0   :  { %v304_v23 = vpop.permute.xlu0 %303 }
 0x6e1   :  { %v306_v24 = vsel %vm295_vm4, %v304_v23, %v246_v59  ;;  %v105_v59 = vpop.f32.mrf.mxu0 }
 0x6e2   :  { %766 = vmatmul.msk.f32.vlgmr.msra.gmra.mxu1 %vm129_vm2, %v306_v24  ;;  %v106_v61 = vadd.f32 %v931_v12, %v105_v59 }
 0x6e3   :  { %618 = vmatpush.msra.mxu1 %v878_v2 }
 0x6e5   :  { %619 = vmatpush.msra.mxu1 %v884_v3 }
 0x6e7   :  { %620 = vmatpush.msra.mxu1 %v894_v5 }
 0x6e9   :  { %621 = vmatpush.msra.mxu1 %v902_v6 }
 0x6f0   :  { %v336_v35 = vpop.permute.xlu0 %335 }
 0x75f   :  { %v327_v28 = vpop.f32.mrf.mxu1 }
 0x760   :  { %v330_v29 = vadd.f32 %v327_v28, %v100_v27 }
 0x762   :  { %797 = vtanh.f32 %v330_v29 }
 0x768   :  { %v798_v30 = vpop.eup %797 }
 0x769   :  { %340 = vrot.lane.b32.xlu2 %v798_v30, %s830_s13  ;;  %v332_v31 = vmul.f32 0.5, %v798_v30 }
 0x76b   :  { %v333_v32 = vadd.f32 0.5, %v332_v31 }
 0x76d   :  { %v338_v38 = vmul.f32 %v336_v35, %v333_v32 }
 0x7c3   :  { %v341_v33 = vpop.permute.xlu2 %340 }
 0x7c4   :  { %v343_v34 = vmul.f32 %v341_v33, %v333_v32 }
 0x7c6   :  { %345 = vrot.lane.b32.xlu1 %v343_v34, %s831_s14  ;;  %v112_v34 = vadd.f32 %v931_v12, %v926_v10 }
 0x838   :  { %v346_v39 = vpop.permute.xlu1 %345 }
 0x839   :  { %v348_v40 = vadd.f32 %v346_v39, %v338_v38 }
 0x83b   :  { %799 = vtanh.f32 %v348_v40 }
 0x841   :  { %v800_v41 = vpop.eup %799 }
 0x842   :  { %351 = vrot.lane.b32.xlu2 %v800_v41, %s830_s13 }
 0x89c   :  { %v352_v42 = vpop.permute.xlu2 %351 }
 0x89d   :  { %v354_v43 = vmul.f32 %v352_v42, %v333_v32 }
 0x89f   :  { %356 = vrot.lane.b32.xlu0 %v354_v43, %s831_s14 }
 0x911   :  { %v357_v45 = vpop.permute.xlu0 %356 }
 0x912   :  { %767 = vmatmul.msk.f32.vlgmr.msra.gmra.mxu2 %vm129_vm2, %v357_v45 }
 0x913   :  { %678 = vmatpush.msra.mxu2 %v878_v2 }
 0x915   :  { %679 = vmatpush.msra.mxu2 %v884_v3 }
 0x917   :  { %680 = vmatpush.msra.mxu2 %v894_v5 }
 0x919   :  { %681 = vmatpush.msra.mxu2 %v902_v6 }
 0x995   :  { %v377_v48 = vpop.f32.mrf.mxu2 }
 0x996   :  { %v380_v49 = vadd.f32 %v377_v48, %v103_v47 }
 0x998   :  { %801 = vtanh.f32 %v380_v49 }
 0x99e   :  { %v802_v50 = vpop.eup %801 }
 0x99f   :  { %386 = vrot.lane.b32.xlu1 %v802_v50, %s830_s13  ;;  %v382_v51 = vmul.f32 0.5, %v802_v50  ;;  %v115_v50 = vadd.f32 %v931_v12, %v968_v36 }
 0x9a1   :  { %v383_v52 = vadd.f32 0.5, %v382_v51 }
 0x9a3   :  { %v384_v2 = vmul.f32 %v383_v52, %v348_v40 }
 0xa11   :  { %v387_v53 = vpop.permute.xlu1 %386 }
 0xa12   :  { %v389_v54 = vmul.f32 %v387_v53, %v383_v52 }
 0xa14   :  { %391 = vrot.lane.b32.xlu2 %v389_v54, %s831_s14 }
 0xa6e   :  { %v392_v3 = vpop.permute.xlu2 %391 }
 0xa6f   :  { %v394_v5 = vadd.f32 %v392_v3, %v384_v2 }
 0xa71   :  { %803 = vtanh.f32 %v394_v5 }
 0xa77   :  { %v804_v6 = vpop.eup %803 }
 0xa78   :  { %397 = vrot.lane.b32.xlu0 %v804_v6, %s830_s13 }
 0xaea   :  { %v398_v55 = vpop.permute.xlu0 %397 }
 0xaeb   :  { %v400_v56 = vmul.f32 %v398_v55, %v383_v52 }
 0xaed   :  { %402 = vrot.lane.b32.xlu1 %v400_v56, %s831_s14 }
 0xb5f   :  { %v403_v58 = vpop.permute.xlu1 %402 }
 0xb60   :  { %768 = vmatmul.msk.f32.vlgmr.msra.gmra.mxu3 %vm129_vm2, %v403_v58 }
 0xbe3   :  { %v423_v62 = vpop.f32.mrf.mxu3 }
 0xbe4   :  { %v426_v63 = vadd.f32 %v423_v62, %v106_v61 }
 0xbe6   :  { %805 = vtanh.f32 %v426_v63 }
 0xbec   :  { %v806_v0 = vpop.eup %805 }
 0xbed   :  { %432 = vrot.lane.b32.xlu2 %v806_v0, %s830_s13  ;;  %v428_v1 = vmul.f32 0.5, %v806_v0 }
 0xbef   :  { %v429_v4 = vadd.f32 0.5, %v428_v1  ;;  %v118_v1 = vadd.f32 %v931_v12, %v970_v37 }
 0xbf1   :  { %v430_v11 = vmul.f32 %v429_v4, %v394_v5 }
 0xc47   :  { %v433_v7 = vpop.permute.xlu2 %432 }
 0xc48   :  { %v435_v8 = vmul.f32 %v433_v7, %v429_v4 }
 0xc4a   :  { %437 = vrot.lane.b32.xlu0 %v435_v8, %s831_s14 }
 0xcbc   :  { %v438_v13 = vpop.permute.xlu0 %437 }
 0xcbd   :  { %v440_v14 = vadd.f32 %v438_v13, %v430_v11 }
 0xcbf   :  { %807 = vtanh.f32 %v440_v14 }
 0xcc5   :  { %v808_v15 = vpop.eup %807 }
 0xcc6   :  { %443 = vrot.lane.b32.xlu1 %v808_v15, %s830_s13 }
 0xd38   :  { %v444_v16 = vpop.permute.xlu1 %443 }
 0xd39   :  { %v446_v17 = vmul.f32 %v444_v16, %v429_v4 }
 0xd3b   :  { %448 = vrot.lane.b32.xlu2 %v446_v17, %s831_s14 }
 0xd95   :  { %v449_v18 = vpop.permute.xlu2 %448 }
 0xd96   :  { %769 = vmatmul.msk.f32.vlgmr.msrb.gmra.mxu1 %vm129_vm2, %v449_v18 }
 0xe13   :  { %v469_v20 = vpop.f32.mrf.mxu1 }
 0xe14   :  { %v472_v21 = vadd.f32 %v469_v20, %v109_v19 }
 0xe16   :  { %809 = vtanh.f32 %v472_v21 }
 0xe1c   :  { %v810_v22 = vpop.eup %809 }
 0xe1d   :  { %478 = vrot.lane.b32.xlu0 %v810_v22, %s830_s13  ;;  %v474_v23 = vmul.f32 0.5, %v810_v22 }
 0xe1f   :  { %v475_v24 = vadd.f32 0.5, %v474_v23 }
 0xe21   :  { %v476_v28 = vmul.f32 %v475_v24, %v440_v14 }
 0xe8f   :  { %v479_v25 = vpop.permute.xlu0 %478 }
 0xe90   :  { %v481_v27 = vmul.f32 %v479_v25, %v475_v24 }
 0xe92   :  { %483 = vrot.lane.b32.xlu1 %v481_v27, %s831_s14  ;;  %v121_v27 = vadd.f32 %v931_v12, %v997_v60 }
 0xf04   :  { %v484_v29 = vpop.permute.xlu1 %483 }
 0xf05   :  { %v486_v30 = vadd.f32 %v484_v29, %v476_v28 }
 0xf07   :  { %811 = vtanh.f32 %v486_v30 }
 0xf0d   :  { %v812_v31 = vpop.eup %811 }
 0xf0e   :  { %489 = vrot.lane.b32.xlu2 %v812_v31, %s830_s13 }
 0xf68   :  { %v490_v9 = vpop.permute.xlu2 %489 }
 0xf69   :  { %v492_v32 = vmul.f32 %v490_v9, %v475_v24 }
 0xf6b   :  { %494 = vrot.lane.b32.xlu0 %v492_v32, %s831_s14 }
 0xfdd   :  { %v495_v33 = vpop.permute.xlu0 %494 }
 0xfde   :  { %770 = vmatmul.msk.f32.vlgmr.msrb.gmra.mxu2 %vm129_vm2, %v495_v33 }
0x1061   :  { %v515_v35 = vpop.f32.mrf.mxu2 }
0x1062   :  { %v518_v38 = vadd.f32 %v515_v35, %v112_v34 }
0x1064   :  { %813 = vtanh.f32 %v518_v38 }
0x106a   :  { %v814_v39 = vpop.eup %813 }
0x106b   :  { %524 = vrot.lane.b32.xlu1 %v814_v39, %s830_s13  ;;  %v520_v40 = vmul.f32 0.5, %v814_v39 }
0x106d   :  { %v521_v41 = vadd.f32 0.5, %v520_v40 }
0x106f   :  { %v522_v44 = vmul.f32 %v521_v41, %v486_v30 }
0x10dd   :  { %v525_v42 = vpop.permute.xlu1 %524 }
0x10de   :  { %v527_v43 = vmul.f32 %v525_v42, %v521_v41 }
0x10e0   :  { %529 = vrot.lane.b32.xlu2 %v527_v43, %s831_s14 }
0x113a   :  { %v530_v45 = vpop.permute.xlu2 %529 }
0x113b   :  { %v532_v46 = vadd.f32 %v530_v45, %v522_v44  ;;  %v784_v45 = vld [vmem:[%s1110_s5] ss:$0 sm:$0xff] }
0x113d   :  { %815 = vtanh.f32 %v532_v46 }
0x1143   :  { %v816_v47 = vpop.eup %815 }
0x1144   :  { %535 = vrot.lane.b32.xlu0 %v816_v47, %s830_s13 }
0x11b6   :  { %v536_v10 = vpop.permute.xlu0 %535 }
0x11b7   :  { %v538_v48 = vmul.f32 %v536_v10, %v521_v41  ;;  %v718_v41 = vld [vmem:[%s1109_s4] sm:$0xff] }
0x11b8   :  { %743 = vmatpush.msra.mxu3 %v718_v41 }
0x11b9   :  { %540 = vrot.lane.b32.xlu1 %v538_v48, %s831_s14 }
0x122b   :  { %v541_v49 = vpop.permute.xlu1 %540 }
0x122c   :  { %771 = vmatmul.msk.f32.vlgmr.msrb.gmra.mxu3 %vm129_vm2, %v541_v49 }
0x12af   :  { %v561_v51 = vpop.f32.mrf.mxu3 }
0x12b0   :  { %v564_v52 = vadd.f32 %v561_v51, %v115_v50 }
0x12b2   :  { %817 = vtanh.f32 %v564_v52 }
0x12b8   :  { %v818_v53 = vpop.eup %817 }
0x12b9   :  { %570 = vrot.lane.b32.xlu2 %v818_v53, %s830_s13  ;;  %v566_v54 = vmul.f32 0.5, %v818_v53 }
0x12bb   :  { %v567_v2 = vadd.f32 0.5, %v566_v54 }
0x12bd   :  { %v568_v6 = vmul.f32 %v567_v2, %v532_v46 }
0x1313   :  { %v571_v3 = vpop.permute.xlu2 %570 }
0x1314   :  { %v573_v5 = vmul.f32 %v571_v3, %v567_v2 }
0x1316   :  { %575 = vrot.lane.b32.xlu0 %v573_v5, %s831_s14 }
0x1388   :  { %v576_v55 = vpop.permute.xlu0 %575 }
0x1389   :  { %v578_v56 = vadd.f32 %v576_v55, %v568_v6 }
0x138b   :  { %819 = vtanh.f32 %v578_v56  ;;  %589 = vrot.lane.b32.xlu0 %v578_v56, %s832_s3 }
0x1391   :  { %v820_v57 = vpop.eup %819 }
0x1392   :  { %581 = vrot.lane.b32.xlu1 %v820_v57, %s830_s13 }
0x139a   :  { %593 = vrot.lane.b32.xlu1 %v532_v46, %s832_s3 }
0x13fd   :  { %v590_v59 = vpop.permute.xlu0 %589 }
0x1404   :  { %v582_v36 = vpop.permute.xlu1 %581 }
0x1405   :  { %v584_v58 = vmul.f32 %v582_v36, %v567_v2 }
0x1407   :  { %598 = vrot.lane.b32.xlu2 %v584_v58, %s831_s14 }
0x140c   :  { %v594_v61 = vpop.permute.xlu1 %593 }
0x140d   :  { %v596_v62 = vsel %vm587_vm7, %v590_v59, %v594_v61 }
0x140e   :  { %631 = vrot.lane.b32.xlu0 %v596_v62, %s831_s14 }
0x1461   :  { %v599_v63 = vpop.permute.xlu2 %598 }
0x1462   :  { %v602_v0 = vsel %vm587_vm7, %v599_v63, %v541_v49 }
0x1463   :  { %772 = vmatmul.msk.f32.vlgmr.msra.gmra.mxu1 %vm129_vm2, %v602_v0 }
0x1480   :  { %v632_v16 = vpop.permute.xlu0 %631 }
0x14e0   :  { %v623_v4 = vpop.f32.mrf.mxu1 }
0x14e1   :  { %v626_v7 = vadd.f32 %v623_v4, %v118_v1 }
0x14e3   :  { %821 = vtanh.f32 %v626_v7 }
0x14e9   :  { %v822_v8 = vpop.eup %821 }
0x14ea   :  { %636 = vrot.lane.b32.xlu2 %v822_v8, %s830_s13  ;;  %v628_v11 = vmul.f32 0.5, %v822_v8 }
0x14ec   :  { %v629_v13 = vadd.f32 0.5, %v628_v11 }
0x14ee   :  { %v634_v17 = vmul.f32 %v632_v16, %v629_v13 }
0x1544   :  { %v637_v14 = vpop.permute.xlu2 %636 }
0x1545   :  { %v639_v15 = vmul.f32 %v637_v14, %v629_v13 }
0x1547   :  { %641 = vrot.lane.b32.xlu1 %v639_v15, %s831_s14 }
0x15b9   :  { %v642_v18 = vpop.permute.xlu1 %641 }
0x15ba   :  { %v644_v19 = vadd.f32 %v642_v18, %v634_v17 }
0x15bc   :  { %823 = vtanh.f32 %v644_v19  ;;  %654 = vrot.lane.b32.xlu1 %v644_v19, %s832_s3 }
0x15c2   :  { %v824_v37 = vpop.eup %823 }
0x15c3   :  { %647 = vrot.lane.b32.xlu2 %v824_v37, %s830_s13 }
0x161d   :  { %v648_v20 = vpop.permute.xlu2 %647 }
0x161e   :  { %v650_v21 = vmul.f32 %v648_v20, %v629_v13 }
0x1620   :  { %659 = vrot.lane.b32.xlu0 %v650_v21, %s831_s14 }
0x162e   :  { %v655_v22 = vpop.permute.xlu1 %654 }
0x162f   :  { %v657_v23 = vsel %vm652_vm9, %v655_v22, %v596_v62 }
0x1630   :  { %691 = vrot.lane.b32.xlu0 %v657_v23, %s831_s14 }
0x1692   :  { %v660_v24 = vpop.permute.xlu0 %659 }
0x1693   :  { %v662_v25 = vsel %vm652_vm9, %v660_v24, %v602_v0 }
0x1694   :  { %773 = vmatmul.msk.f32.vlgmr.msra.gmra.mxu2 %vm129_vm2, %v662_v25 }
0x16a2   :  { %v692_v34 = vpop.permute.xlu0 %691 }
0x1717   :  { %v683_v28 = vpop.f32.mrf.mxu2 }
0x1718   :  { %v686_v29 = vadd.f32 %v683_v28, %v121_v27 }
0x171a   :  { %825 = vtanh.f32 %v686_v29 }
0x1720   :  { %v826_v30 = vpop.eup %825 }
0x1721   :  { %696 = vrot.lane.b32.xlu2 %v826_v30, %s830_s13  ;;  %v688_v31 = vmul.f32 0.5, %v826_v30 }
0x1723   :  { %v689_v9 = vadd.f32 0.5, %v688_v31 }
0x1725   :  { %v694_v35 = vmul.f32 %v692_v34, %v689_v9 }
0x177b   :  { %v697_v32 = vpop.permute.xlu2 %696 }
0x177c   :  { %v699_v33 = vmul.f32 %v697_v32, %v689_v9 }
0x177e   :  { %701 = vrot.lane.b32.xlu1 %v699_v33, %s831_s14 }
0x17f0   :  { %v702_v38 = vpop.permute.xlu1 %701 }
0x17f1   :  { %v704_v39 = vadd.f32 %v702_v38, %v694_v35 }
0x17f3   :  { %827 = vtanh.f32 %v704_v39 }
0x17f9   :  { %v828_v40 = vpop.eup %827 }
0x17fa   :  { %707 = vrot.lane.b32.xlu2 %v828_v40, %s830_s13 }
0x1854   :  { %v708_v12 = vpop.permute.xlu2 %707 }
0x1855   :  { %v710_v60 = vmul.f32 %v708_v12, %v689_v9 }
0x1857   :  { %714 = vrot.lane.b32.xlu0 %v710_v60, %s831_s14 }
0x18c9   :  { %v715_v42 = vpop.permute.xlu0 %714 }
0x18ca   :  { %v717_v43 = vsel %vm712_vm11, %v715_v42, %v662_v25 }
0x18cb   :  { %724 = vrot.lane.b32.xlu1 %v717_v43, %s833_s7 }
0x193d   :  { %v725_v44 = vpop.permute.xlu1 %724 }
0x193e   :  { %774 = vmatmul.msk.f32.vlgmr.msra.gmra.mxu3 %vm39_vm0, %v725_v44 }
0x19c1   :  { %v745_v46 = vpop.f32.mrf.mxu3 }
0x19c2   :  { %v746_v47 = vadd.f32 %v784_v45, %v745_v46 }
0x19c4   :  { %748 = vst [vmem:[%s1111_s6] sm:$0xff] %v746_v47 }

</bundles_post_ra>
